<compile_context>
chip_gen: v7x
topology: tpu7x:2x2x1
jax: 0.10.0
libtpu: 0.0.40
codegen_flags: <defaults>
</compile_context>

<pallas_src>
import jax
import jax.numpy as jnp
from jax import lax
from jax.experimental import pallas as pl
from jax.experimental.pallas import tpu as pltpu


OUT_ROWS = 16  # 13 valid output rows (class 0:5, domain 5:13) padded to 2 sublane tiles


def _dann_kernel(
    x_ref,
    w1_ref, b1_ref,       # Linear1 with BN1 folded in
    w2_ref, b2_ref,       # Linear2 with BN2 folded in
    wh_ref, bh_ref,       # fused head first layers  [wc1 | wd1]
    woT_ref, boT_ref,     # fused head second layers, transposed + zero-padded (block-diag)
    out_ref,              # (OUT_ROWS, TB) transposed, lane-dense output slab
):
    x = x_ref[...]

    # --- feature extractor (BN folded; Dropout identity in eval mode) ---
    h = jnp.dot(x, w1_ref[...], preferred_element_type=jnp.float32) + b1_ref[...]
    h = jnp.maximum(h, 0.0)                                             # ReLU
    f = jnp.dot(h.astype(w2_ref.dtype), w2_ref[...],
                preferred_element_type=jnp.float32) + b2_ref[...]

    # --- both heads, first layers fused into one wider matmul ---
    # GradientReversal is identity in the forward pass.
    g = jnp.dot(f.astype(wh_ref.dtype), wh_ref[...],
                preferred_element_type=jnp.float32) + bh_ref[...]
    g = jnp.maximum(g, 0.0)                                             # ReLU

    # --- fused second layers, emitted transposed (batch on the lane axis):
    #     out_T[o, b] = sum_k woT[o, k] * g[b, k]    ->  (OUT_ROWS, TB)
    out_t = lax.dot_general(
        woT_ref[...], g.astype(woT_ref.dtype),
        dimension_numbers=(((1,), (1,)), ((), ())),
        preferred_element_type=jnp.float32,
    )
    out_ref[...] = out_t + boT_ref[...]


def make_dann_params(key, input_dim, hidden_dim):
    """Deterministic synthetic parameters (shapes match the PyTorch module)."""
    h2 = hidden_dim // 2
    h4 = hidden_dim // 4
    ks = jax.random.split(key, 6)

    def lin(k, fan_in, fan_out):
        kw, kb = jax.random.split(k)
        bound = 1.0 / jnp.sqrt(fan_in)
        w = jax.random.uniform(kw, (fan_in, fan_out), jnp.float32, -bound, bound)
        b = jax.random.uniform(kb, (1, fan_out), jnp.float32, -bound, bound)
        return w, b

    p = {}
    p["w1"], p["b1"] = lin(ks[0], input_dim, hidden_dim)
    p["w2"], p["b2"] = lin(ks[1], hidden_dim, h2)
    p["wc1"], p["bc1"] = lin(ks[2], h2, h4)
    p["wc2"], p["bc2"] = lin(ks[3], h4, 5)
    p["wd1"], p["bd1"] = lin(ks[4], h2, h4)
    p["wd2"], p["bd2"] = lin(ks[5], h4, 8)

    # BatchNorm1d at PyTorch init: gamma=1, beta=0, running_mean=0,
    # running_var=1, eps=1e-5.  Represent as eval-mode scale/shift.
    eps = 1e-5
    for name, dim in (("1", hidden_dim), ("2", h2)):
        gamma = jnp.ones((1, dim), jnp.float32)
        beta = jnp.zeros((1, dim), jnp.float32)
        rmean = jnp.zeros((1, dim), jnp.float32)
        rvar = jnp.ones((1, dim), jnp.float32)
        scale = gamma / jnp.sqrt(rvar + eps)
        shift = beta - rmean * scale
        p["s" + name] = scale
        p["t" + name] = shift
    return p


def _prepare_kernel_params(params, matmul_dtype=jnp.float32):
    """Fold BN into the Linears, fuse heads, build the transposed output weight."""
    # Fold eval-mode BN (exact, affine-after-affine): (x@W + b) * s + t = x@(W*s) + (b*s + t)
    w1 = (params["w1"] * params["s1"]).astype(matmul_dtype)
    b1 = params["b1"] * params["s1"] + params["t1"]
    w2 = (params["w2"] * params["s2"]).astype(matmul_dtype)
    b2 = params["b2"] * params["s2"] + params["t2"]

    # Fuse the two head first layers along the output dimension.
    wh = jnp.concatenate([params["wc1"], params["wd1"]], axis=1).astype(matmul_dtype)
    bh = jnp.concatenate([params["bc1"], params["bd1"]], axis=1)

    # Fuse + zero-pad the second layers into a block-diagonal TRANSPOSED
    # (OUT_ROWS, 2*h4) weight so the kernel writes a narrow, lane-dense,
    # batch-on-lanes (OUT_ROWS, TB) slab.
    h4 = params["wc1"].shape[1]
    n_c = params["wc2"].shape[1]   # 5
    n_d = params["wd2"].shape[1]   # 8
    assert n_c + n_d <= OUT_ROWS
    woT = jnp.zeros((OUT_ROWS, 2 * h4), jnp.float32)
    woT = woT.at[:n_c, :h4].set(params["wc2"].T)
    woT = woT.at[n_c:n_c + n_d, h4:].set(params["wd2"].T)
    woT = woT.astype(matmul_dtype)
    boT = jnp.zeros((OUT_ROWS, 1), jnp.float32)
    boT = boT.at[:n_c, 0].set(params["bc2"][0])
    boT = boT.at[n_c:n_c + n_d, 0].set(params["bd2"][0])

    return (w1, b1, w2, b2, wh, bh, woT, boT), n_c, n_d


def _round_up(x, m):
    return ((x + m - 1) // m) * m


def dann_forward(x, params, *, tile_b=2048, use_bf16=False):
    """Returns (class_pred, domain_pred) — training-mode forward outputs."""
    B, input_dim = x.shape
    matmul_dtype = jnp.bfloat16 if use_bf16 else jnp.float32
    weights, n_c, n_d = _prepare_kernel_params(params, matmul_dtype)

    # Batch lives on the lane axis of the output, so pad only to a multiple of
    # 128 (NOT to a multiple of the tile; the ceiling-divide grid handles a
    # partial trailing block).
    padded_B = _round_up(B, 128)
    x = x.astype(matmul_dtype)
    if padded_B != B:
        x = jnp.pad(x, ((0, padded_B - B), (0, 0)))

    TB = min(_round_up(tile_b, 128), padded_B)
    if TB >= padded_B and padded_B >= 256:
        # Guarantee >=2 grid steps so ("parallel",) can use both TCs on v7x.
        TB = _round_up(padded_B // 2, 128)
    grid = ((padded_B + TB - 1) // TB,)

    # x / out stream through the auto double-buffer pipeline; weights stay
    # resident in VMEM (constant block index across the batch grid axis).
    x_spec = pl.BlockSpec((TB, input_dim), lambda i: (i, 0))
    w_specs = [pl.BlockSpec(w.shape, lambda i: (0, 0)) for w in weights]
    out_spec = pl.BlockSpec((OUT_ROWS, TB), lambda i: (0, i))

    out_t = pl.pallas_call(
        _dann_kernel,
        out_shape=jax.ShapeDtypeStruct((OUT_ROWS, padded_B), jnp.float32),
        grid=grid,
        in_specs=[x_spec] + w_specs,
        out_specs=out_spec,
        compiler_params=pltpu.CompilerParams(
            dimension_semantics=("parallel",),
            vmem_limit_bytes=48 * 1024 * 1024,
        ),
    )(x, *weights)

    class_pred = out_t[:n_c, :B].T
    domain_pred = out_t[n_c:n_c + n_d, :B].T
    return class_pred, domain_pred


def dann_reference(x, params):
    """Pure-JAX reference mirroring the PyTorch module (eval-mode BN/Dropout)."""
    h = x @ params["w1"] + params["b1"]
    h = h * params["s1"] + params["t1"]
    h = jnp.maximum(h, 0.0)
    f = h @ params["w2"] + params["b2"]
    f = f * params["s2"] + params["t2"]
    c = jnp.maximum(f @ params["wc1"] + params["bc1"], 0.0)
    class_pred = c @ params["wc2"] + params["bc2"]
    d = jnp.maximum(f @ params["wd1"] + params["bd1"], 0.0)
    domain_pred = d @ params["wd2"] + params["bd2"]
    return class_pred, domain_pred


if __name__ == "__main__":
    key = jax.random.PRNGKey(0)
    k_x, k_p, k_x2 = jax.random.split(key, 3)

    batch, input_dim, hidden_dim = 8, 16, 32
    x = jax.random.normal(k_x, (batch, input_dim), jnp.float32)
    params = make_dann_params(k_p, input_dim, hidden_dim)

    # Exact f32 path.
    class_pred, domain_pred = dann_forward(x, params)
    jax.block_until_ready((class_pred, domain_pred))
    ref_c, ref_d = dann_reference(x, params)
    assert class_pred.shape == (batch, 5) and domain_pred.shape == (batch, 8)
    assert jnp.allclose(class_pred, ref_c, atol=1e-4, rtol=1e-4)
    assert jnp.allclose(domain_pred, ref_d, atol=1e-4, rtol=1e-4)

    # Multi-step grid with a partial trailing block (no pad-to-tile blowup).
    batch2 = 300
    x2 = jax.random.normal(k_x2, (batch2, input_dim), jnp.float32)
    c2, d2 = dann_forward(x2, params, tile_b=256)
    jax.block_until_ready((c2, d2))
    r2c, r2d = dann_reference(x2, params)
    assert c2.shape == (batch2, 5) and d2.shape == (batch2, 8)
    assert jnp.allclose(c2, r2c, atol=1e-4, rtol=1e-4)
    assert jnp.allclose(d2, r2d, atol=1e-4, rtol=1e-4)

    # bf16-operand path (recommended on v6e/v7x); f32 accumulation, loose tol.
    cb, db = dann_forward(x, params, use_bf16=True)
    jax.block_until_ready((cb, db))
    assert jnp.allclose(cb, ref_c, atol=0.25, rtol=0.05)
    assert jnp.allclose(db, ref_d, atol=0.25, rtol=0.05)

    print("KERNEL_OK")
</pallas_src>

<mosaic_0001>
module attributes {stable_mosaic.version = 11 : i64} {
  func.func @_dann_kernel(%arg0: i32, %arg1: memref<128x16xf32, #tpu.memory_space<vmem>>, %arg2: memref<16x32xf32, #tpu.memory_space<vmem>>, %arg3: memref<1x32xf32, #tpu.memory_space<vmem>>, %arg4: memref<32x16xf32, #tpu.memory_space<vmem>>, %arg5: memref<1x16xf32, #tpu.memory_space<vmem>>, %arg6: memref<16x16xf32, #tpu.memory_space<vmem>>, %arg7: memref<1x16xf32, #tpu.memory_space<vmem>>, %arg8: memref<16x16xf32, #tpu.memory_space<vmem>>, %arg9: memref<16x1xf32, #tpu.memory_space<vmem>>, %arg10: memref<16x128xf32, #tpu.memory_space<vmem>>) attributes {dimension_semantics = [#tpu.dimension_semantics<parallel>], iteration_bounds = array<i64: 1>, scalar_prefetch = 0 : i64, scratch_operands = 0 : i64, tpu.core_type = #tpu.core_type<tc>, window_params = [{transform_indices = @transform_0, window_bounds = array<i64: 128, 16>}, {pipeline_mode = #tpu.pipeline_mode<synchronous>, transform_indices = @transform_1, window_bounds = array<i64: 16, 32>}, {pipeline_mode = #tpu.pipeline_mode<synchronous>, transform_indices = @transform_2, window_bounds = array<i64: 1, 32>}, {pipeline_mode = #tpu.pipeline_mode<synchronous>, transform_indices = @transform_3, window_bounds = array<i64: 32, 16>}, {pipeline_mode = #tpu.pipeline_mode<synchronous>, transform_indices = @transform_4, window_bounds = array<i64: 1, 16>}, {pipeline_mode = #tpu.pipeline_mode<synchronous>, transform_indices = @transform_5, window_bounds = array<i64: 16, 16>}, {pipeline_mode = #tpu.pipeline_mode<synchronous>, transform_indices = @transform_6, window_bounds = array<i64: 1, 16>}, {pipeline_mode = #tpu.pipeline_mode<synchronous>, transform_indices = @transform_7, window_bounds = array<i64: 16, 16>}, {pipeline_mode = #tpu.pipeline_mode<synchronous>, transform_indices = @transform_8, window_bounds = array<i64: 16, 1>}, {transform_indices = @transform_9, window_bounds = array<i64: 16, 128>}]} {
    %c0 = arith.constant 0 : index
    %c0_0 = arith.constant 0 : index
    %0 = vector.load %arg1[%c0, %c0_0] : memref<128x16xf32, #tpu.memory_space<vmem>>, vector<128x16xf32>
    %c0_1 = arith.constant 0 : index
    %c0_2 = arith.constant 0 : index
    %1 = vector.load %arg2[%c0_1, %c0_2] : memref<16x32xf32, #tpu.memory_space<vmem>>, vector<16x32xf32>
    %cst = arith.constant dense<0.000000e+00> : vector<128x32xf32>
    %2 = tpu.matmul %0, %1, %cst {dimension_numbers = #tpu.dot_dimension_numbers<[1], [0], [0], [1], [0, 0, 1, 1], [], []>} : vector<128x16xf32>, vector<16x32xf32>, vector<128x32xf32> -> vector<128x32xf32>
    %c0_3 = arith.constant 0 : index
    %c0_4 = arith.constant 0 : index
    %3 = vector.load %arg3[%c0_3, %c0_4] : memref<1x32xf32, #tpu.memory_space<vmem>>, vector<1x32xf32>
    %4 = vector.broadcast %3 : vector<1x32xf32> to vector<128x32xf32>
    %5 = arith.addf %2, %4 : vector<128x32xf32>
    %cst_5 = arith.constant 0.000000e+00 : f32
    %6 = vector.broadcast %cst_5 : f32 to vector<128x32xf32>
    %7 = arith.maximumf %5, %6 : vector<128x32xf32>
    %c0_6 = arith.constant 0 : index
    %c0_7 = arith.constant 0 : index
    %8 = vector.load %arg4[%c0_6, %c0_7] : memref<32x16xf32, #tpu.memory_space<vmem>>, vector<32x16xf32>
    %cst_8 = arith.constant dense<0.000000e+00> : vector<128x16xf32>
    %9 = tpu.matmul %7, %8, %cst_8 {dimension_numbers = #tpu.dot_dimension_numbers<[1], [0], [0], [1], [0, 0, 1, 1], [], []>} : vector<128x32xf32>, vector<32x16xf32>, vector<128x16xf32> -> vector<128x16xf32>
    %c0_9 = arith.constant 0 : index
    %c0_10 = arith.constant 0 : index
    %10 = vector.load %arg5[%c0_9, %c0_10] : memref<1x16xf32, #tpu.memory_space<vmem>>, vector<1x16xf32>
    %11 = vector.broadcast %10 : vector<1x16xf32> to vector<128x16xf32>
    %12 = arith.addf %9, %11 : vector<128x16xf32>
    %c0_11 = arith.constant 0 : index
    %c0_12 = arith.constant 0 : index
    %13 = vector.load %arg6[%c0_11, %c0_12] : memref<16x16xf32, #tpu.memory_space<vmem>>, vector<16x16xf32>
    %cst_13 = arith.constant dense<0.000000e+00> : vector<128x16xf32>
    %14 = tpu.matmul %12, %13, %cst_13 {dimension_numbers = #tpu.dot_dimension_numbers<[1], [0], [0], [1], [0, 0, 1, 1], [], []>} : vector<128x16xf32>, vector<16x16xf32>, vector<128x16xf32> -> vector<128x16xf32>
    %c0_14 = arith.constant 0 : index
    %c0_15 = arith.constant 0 : index
    %15 = vector.load %arg7[%c0_14, %c0_15] : memref<1x16xf32, #tpu.memory_space<vmem>>, vector<1x16xf32>
    %16 = vector.broadcast %15 : vector<1x16xf32> to vector<128x16xf32>
    %17 = arith.addf %14, %16 : vector<128x16xf32>
    %cst_16 = arith.constant 0.000000e+00 : f32
    %18 = vector.broadcast %cst_16 : f32 to vector<128x16xf32>
    %19 = arith.maximumf %17, %18 : vector<128x16xf32>
    %c0_17 = arith.constant 0 : index
    %c0_18 = arith.constant 0 : index
    %20 = vector.load %arg8[%c0_17, %c0_18] : memref<16x16xf32, #tpu.memory_space<vmem>>, vector<16x16xf32>
    %cst_19 = arith.constant dense<0.000000e+00> : vector<16x128xf32>
    %21 = tpu.matmul %20, %19, %cst_19 {dimension_numbers = #tpu.dot_dimension_numbers<[1], [1], [0], [0], [0, 0, 1, 0], [], []>} : vector<16x16xf32>, vector<128x16xf32>, vector<16x128xf32> -> vector<16x128xf32>
    %c0_20 = arith.constant 0 : index
    %c0_21 = arith.constant 0 : index
    %22 = vector.load %arg9[%c0_20, %c0_21] : memref<16x1xf32, #tpu.memory_space<vmem>>, vector<16x1xf32>
    %23 = vector.broadcast %22 : vector<16x1xf32> to vector<16x128xf32>
    %24 = arith.addf %21, %23 : vector<16x128xf32>
    %c0_22 = arith.constant 0 : index
    %c0_23 = arith.constant 0 : index
    %25 = vector.load %arg10[%c0_22, %c0_23] : memref<16x128xf32, #tpu.memory_space<vmem>>, vector<16x128xf32>
    tpu.vector_store %arg10[%c0_22, %c0_23], %24 {strides = array<i32>} : memref<16x128xf32, #tpu.memory_space<vmem>>, vector<16x128xf32>,
    return
  }
  func.func @transform_0(%arg0: i32) -> (i32, i32) {
    %c0_i32 = arith.constant 0 : i32
    %c0_i32_0 = arith.constant 0 : i32
    return %arg0, %c0_i32 : i32, i32
  }
  func.func @transform_1(%arg0: i32) -> (i32, i32) {
    %c0_i32 = arith.constant 0 : i32
    %c0_i32_0 = arith.constant 0 : i32
    %c0_i32_1 = arith.constant 0 : i32
    return %c0_i32, %c0_i32_0 : i32, i32
  }
  func.func @transform_2(%arg0: i32) -> (i32, i32) {
    %c0_i32 = arith.constant 0 : i32
    %c0_i32_0 = arith.constant 0 : i32
    %c0_i32_1 = arith.constant 0 : i32
    return %c0_i32, %c0_i32_0 : i32, i32
  }
  func.func @transform_3(%arg0: i32) -> (i32, i32) {
    %c0_i32 = arith.constant 0 : i32
    %c0_i32_0 = arith.constant 0 : i32
    %c0_i32_1 = arith.constant 0 : i32
    return %c0_i32, %c0_i32_0 : i32, i32
  }
  func.func @transform_4(%arg0: i32) -> (i32, i32) {
    %c0_i32 = arith.constant 0 : i32
    %c0_i32_0 = arith.constant 0 : i32
    %c0_i32_1 = arith.constant 0 : i32
    return %c0_i32, %c0_i32_0 : i32, i32
  }
  func.func @transform_5(%arg0: i32) -> (i32, i32) {
    %c0_i32 = arith.constant 0 : i32
    %c0_i32_0 = arith.constant 0 : i32
    %c0_i32_1 = arith.constant 0 : i32
    return %c0_i32, %c0_i32_0 : i32, i32
  }
  func.func @transform_6(%arg0: i32) -> (i32, i32) {
    %c0_i32 = arith.constant 0 : i32
    %c0_i32_0 = arith.constant 0 : i32
    %c0_i32_1 = arith.constant 0 : i32
    return %c0_i32, %c0_i32_0 : i32, i32
  }
  func.func @transform_7(%arg0: i32) -> (i32, i32) {
    %c0_i32 = arith.constant 0 : i32
    %c0_i32_0 = arith.constant 0 : i32
    %c0_i32_1 = arith.constant 0 : i32
    return %c0_i32, %c0_i32_0 : i32, i32
  }
  func.func @transform_8(%arg0: i32) -> (i32, i32) {
    %c0_i32 = arith.constant 0 : i32
    %c0_i32_0 = arith.constant 0 : i32
    %c0_i32_1 = arith.constant 0 : i32
    return %c0_i32, %c0_i32_0 : i32, i32
  }
  func.func @transform_9(%arg0: i32) -> (i32, i32) {
    %c0_i32 = arith.constant 0 : i32
    %c0_i32_0 = arith.constant 0 : i32
    return %c0_i32, %arg0 : i32, i32
  }
}

</mosaic_0001>

<bundles_post_ra>
// kernel: tpu_custom_call.1
= control target key start
LH: loop header
LB: loop body
LE: loop exit
PB: predicated region body
PF: predicated region fallthrough
CT: control target
= control target key end

     0   :  { %vm58_vm0 = vcmask 130048   ;;  %s1458_s0 = inlined_call_operand.vmem [shape: f32[128,16], index: 0, kind: input, shape index: {}]   ;;  %s1459_s1 = inlined_call_operand.vmem [shape: f32[16,32], index: 1, kind: input, shape index: {}]   ;;  %s1460_s2 = inlined_call_operand.vmem [shape: f32[1,32], index: 2, kind: input, shape index: {}]   ;;  %s1461_s3 = inlined_call_operand.vmem [shape: f32[32,16], index: 3, kind: input, shape index: {}]   ;;  %s1462_s4 = inlined_call_operand.vmem [shape: f32[1,16], index: 4, kind: input, shape index: {}]   ;;  %s1463_s5 = inlined_call_operand.vmem [shape: f32[16,16], index: 5, kind: input, shape index: {}]   ;;  %s1464_s6 = inlined_call_operand.vmem [shape: f32[1,16], index: 6, kind: input, shape index: {}]   ;;  %s1465_s7 = inlined_call_operand.vmem [shape: f32[16,16], index: 7, kind: input, shape index: {}]   ;;  %s1466_s8 = inlined_call_operand.vmem [shape: f32[16,1], index: 8, kind: input, shape index: {}]   ;;  %s1467_s9 = inlined_call_operand.hbm [shape: f32[16,128], index: 9, kind: output, shape index: {}]  }
   0x1   :  { %v49_v0 = vld [vmem:[%s1459_s1] sm:$0xff]  ;;  %v50_v1 = vld [vmem:[%s1459_s1 + $0x8] sm:$0xff]  ;;  %v35_v5 = vld [vmem:[%s1458_s0 + $0x10] sm:$0xff] }
   0x2   :  { %v33_v2 = vld [vmem:[%s1458_s0] sm:$0xff]  ;;  %v1118_v3 = vpack.c.bf16 %v50_v1, %v49_v0  ;;  %v34_v4 = vld [vmem:[%s1458_s0 + $0x8] sm:$0xff] }
   0x3   :  { %999 = vmatprep.mubr.msk.f32.mxu0 %vm58_vm0, %v33_v2  ;;  %v268_v6 = vld [vmem:[%s1461_s3] sm:$0xff]  ;;  %v269_v7 = vld [vmem:[%s1461_s3 + $0x8] sm:$0xff] }
   0x4   :  { %1119 = vmatprep.subr.bf16.mxu0 %v1118_v3 }
   0x5   :  { %1121 = vmatpush3.bf16.msra.mxu0 %v1118_v3 }
   0x6   :  { %14 = vsyncpa [#allocation3], 0  ;;  %v1122_v8 = vpack.c.bf16 %v269_v7, %v268_v6  ;;  %v36_v9 = vld [vmem:[%s1458_s0 + $0x18] sm:$0xff]  ;;  %v37_v10 = vld [vmem:[%s1458_s0 + $0x20] sm:$0xff]  ;;  %vm279_vm1 = vcmask 261120   ;;  %s1212_s1 = smov [#allocation2]  }
   0x7   :  { %v38_v11 = vld [vmem:[%s1458_s0 + $0x28] sm:$0xff]  ;;  %v39_v12 = vld [vmem:[%s1458_s0 + $0x30] sm:$0xff]  ;;  %v40_v13 = vld [vmem:[%s1458_s0 + $0x38] sm:$0xff]  ;;  %s841_s20 = sshll.u32 %s1212_s1, 4  ;;  %s842_s20 = int_to_ptr.vmem [resolvable:$true] %s841_s20 }
   0x8   :  { %1000 = vmatmul.mubr.msk.f32.vlgmr.msra.gmra.mrb[0].mxu0 %vm58_vm0, %v34_v4  ;;  %1123 = vmatprep.subr.bf16.mxu1 %v1122_v8  ;;  %v41_v14 = vld [vmem:[%s1458_s0 + $0x40] sm:$0xff]  ;;  %v42_v15 = vld [vmem:[%s1458_s0 + $0x48] sm:$0xff]  ;;  %v43_v16 = vld [vmem:[%s1458_s0 + $0x50] sm:$0xff]  ;;  %s1187_s21 = scalar_lea.vmem %s842_s20, 256  ;;  %p1192_p1 = scmp.lt.s32.totalorder %s842_s20, %s842_s20 }
   0x9   :  { %1002 = vmatprep.mubr.msk.f32.mxu0 %vm58_vm0, %v35_v5  ;;  %1125 = vmatpush3.bf16.msra.mxu1 %v1122_v8  ;;  %v44_v17 = vld [vmem:[%s1458_s0 + $0x58] sm:$0xff]  ;;  %v45_v18 = vld [vmem:[%s1458_s0 + $0x60] sm:$0xff]  ;;  %v46_v19 = vld [vmem:[%s1458_s0 + $0x68] sm:$0xff]  ;;  %p1188_p0 = scmp.ne.s32.totalorder %s842_s20, %s1187_s21  ;;  %p1193_p2 = scmp.lt.s32.totalorder %s1187_s21, %s1187_s21 }
   0xa   :  { %v47_v20 = vld [vmem:[%s1458_s0 + $0x70] sm:$0xff]  ;;  %v48_v21 = vld [vmem:[%s1458_s0 + $0x78] sm:$0xff]  ;;  %v473_v25 = vld [vmem:[%s1463_s5] sm:$0xff] }
   0xb   :  { %v270_v22 = vld [vmem:[%s1461_s3 + $0x10] sm:$0xff]  ;;  %v271_v23 = vld [vmem:[%s1461_s3 + $0x18] sm:$0xff]  ;;  %v474_v26 = vld [vmem:[%s1463_s5 + $0x8] sm:$0xff]  ;;  %p1194_p3 = por %p1193_p2, %p1192_p1 }
   0xc   :  { %1003 = vmatmul.mubr.msk.f32.gmra.mrb[2].mxu0 %vm58_vm0, %v36_v9  ;;  %v1126_v24 = vpack.c.bf16 %v271_v23, %v270_v22  ;;  %v1130_v27 = vpack.c.bf16 %v474_v26, %v473_v25  ;;  %v852_v28 = vld [vmem:[%s1460_s2] ss:$0 sm:$0xff]  ;;  %vm1406_vm2 = vmpackc.low %vm58_vm0, %vm58_vm0 }
   0xd   :  { %1005 = vmatprep.mubr.msk.f32.mxu0 %vm58_vm0, %v37_v10  ;;  %p1195_p4 = pnand %p1194_p3, %p1188_p0 }
   0xe   :  { %1127 = vmatprep.subr.bf16.mxu1 %v1126_v24  ;;  %1131 = vmatprep.subr.bf16.mxu0 %v1130_v27 }
   0xf   :  { %1129 = vmatpush3.bf16.msra.mxu1 %v1126_v24  ;;  %1133 = vmatpush3.bf16.msra.mxu0 %v1130_v27 }
  0x10   :  { %1006 = vmatmul.mubr.msk.f32.gmra.mrb[4].mxu0 %vm58_vm0, %v38_v11 }
  0x11   :  { %1008 = vmatprep.mubr.msk.f32.mxu0 %vm58_vm0, %v39_v12 }
  0x14   :  { %1009 = vmatmul.mubr.msk.f32.gmra.mrb[6].mxu0 %vm58_vm0, %v40_v13  ;;  %v869_v13 = vld [vmem:[%s1462_s4] ss:$0 sm:$0xff] }
  0x15   :  { %1011 = vmatprep.mubr.msk.f32.mxu0 %vm58_vm0, %v41_v14 }
  0x18   :  { %1012 = vmatmul.mubr.msk.f32.gmra.mrb[8].mxu0 %vm58_vm0, %v42_v15 }
  0x19   :  { %1014 = vmatprep.mubr.msk.f32.mxu0 %vm58_vm0, %v43_v16 }
  0x1c   :  { %1015 = vmatmul.mubr.msk.f32.gmra.mrb[10].mxu0 %vm58_vm0, %v44_v17 }
  0x1d   :  { %1017 = vmatprep.mubr.msk.f32.mxu0 %vm58_vm0, %v45_v18 }
  0x20   :  { %1018 = vmatmul.mubr.msk.f32.gmra.mrb[12].mxu0 %vm58_vm0, %v46_v19 }
  0x21   :  { %1020 = vmatprep.mubr.msk.f32.mxu0 %vm58_vm0, %v47_v20 }
  0x24   :  { %1021 = vmatmul.mubr.msk.f32.gmra.mrb[14].mxu0 %vm58_vm0, %v48_v21 }
  0xdb   :  { %v1001_v29 = vpop.f32.mrb[0].mxu0 }
  0xdc   :  { %v179_v30 = vadd.f32 %v1001_v29, %v852_v28  ;;  %v173_v31 = vpop.f32.mrb[1].mxu0 }
  0xdd   :  { %v174_v32 = vadd.f32 %v852_v28, %v173_v31 }
  0xde   :  { %v253_v35 = vmax.f32 %v179_v30, 0.0 }
  0xdf   :  { %v252_v33 = vmax.f32 %v174_v32, 0.0  ;;  %v1004_v34 = vpop.f32.mrb[2].mxu0 }
  0xe0   :  { %v189_v36 = vadd.f32 %v1004_v34, %v852_v28  ;;  %v183_v37 = vpop.f32.mrb[3].mxu0 }
  0xe1   :  { %v184_v38 = vadd.f32 %v852_v28, %v183_v37  ;;  %1031 = vmatprep.mubr.msk.f32.mxu1 %vm279_vm1, %v252_v33 }
  0xe2   :  { %v255_v39 = vmax.f32 %v189_v36, 0.0  ;;  %1032 = vmatmul.mubr.msk.f32.vlgmr.msra.gmra.mrb[0].mxu1 %vm279_vm1, %v253_v35 }
  0xe3   :  { %v254_v40 = vmax.f32 %v184_v38, 0.0  ;;  %v1007_v41 = vpop.f32.mrb[4].mxu0 }
  0xe4   :  { %v199_v42 = vadd.f32 %v1007_v41, %v852_v28  ;;  %v193_v43 = vpop.f32.mrb[5].mxu0 }
  0xe5   :  { %1034 = vmatprep.mubr.msk.f32.mxu1 %vm279_vm1, %v254_v40  ;;  %v194_v44 = vadd.f32 %v852_v28, %v193_v43 }
  0xe6   :  { %v257_v45 = vmax.f32 %v199_v42, 0.0  ;;  %1035 = vmatmul.mubr.msk.f32.gmra.mrb[2].mxu1 %vm279_vm1, %v255_v39 }
  0xe7   :  { %v256_v46 = vmax.f32 %v194_v44, 0.0  ;;  %v1010_v47 = vpop.f32.mrb[6].mxu0 }
  0xe8   :  { %v209_v48 = vadd.f32 %v1010_v47, %v852_v28  ;;  %v203_v49 = vpop.f32.mrb[7].mxu0  ;;  %v693_v47 = vld [vmem:[%s1466_s8] sm:$0xff] }
  0xe9   :  { %1037 = vmatprep.mubr.msk.f32.mxu1 %vm279_vm1, %v256_v46  ;;  %v204_v50 = vadd.f32 %v852_v28, %v203_v49  ;;  %v691_v46 = vld [vmem:[%s1465_s7] sm:$0xff]  ;;  %v694_v49 = vld [vmem:[%s1466_s8 + $0x8] sm:$0xff] }
  0xea   :  { %1038 = vmatmul.mubr.msk.f32.gmra.mrb[4].mxu1 %vm279_vm1, %v257_v45  ;;  %v259_v51 = vmax.f32 %v209_v48, 0.0  ;;  %v1211_v48 = vmov 0  }
  0xeb   :  { %v258_v52 = vmax.f32 %v204_v50, 0.0  ;;  %v1013_v53 = vpop.f32.mrb[8].mxu0  ;;  %1186 = vset.pattern.permute.xlu0 %v1211_v48  ;;  %v886_v50 = vld [vmem:[%s1464_s6] ss:$0 sm:$0xff] }
  0xec   :  { %v219_v54 = vadd.f32 %v1013_v53, %v852_v28  ;;  %v213_v55 = vpop.f32.mrb[9].mxu0  ;;  %697 = vperm.xlu0 %1186, %v693_v47  }
  0xed   :  { %1040 = vmatprep.mubr.msk.f32.mxu1 %vm279_vm1, %v258_v52  ;;  %v214_v56 = vadd.f32 %v852_v28, %v213_v55 }
  0xee   :  { %1041 = vmatmul.mubr.msk.f32.gmra.mrb[6].mxu1 %vm279_vm1, %v259_v51  ;;  %v261_v57 = vmax.f32 %v219_v54, 0.0 }
  0xef   :  { %v260_v58 = vmax.f32 %v214_v56, 0.0  ;;  %v1016_v59 = vpop.f32.mrb[10].mxu0 }
  0xf0   :  { %v229_v60 = vadd.f32 %v1016_v59, %v852_v28  ;;  %v223_v61 = vpop.f32.mrb[11].mxu0  ;;  %702 = vperm.xlu0 %1186, %v694_v49  }
  0xf1   :  { %1043 = vmatprep.mubr.msk.f32.mxu1 %vm279_vm1, %v260_v58  ;;  %v224_v62 = vadd.f32 %v852_v28, %v223_v61 }
  0xf2   :  { %1044 = vmatmul.mubr.msk.f32.gmra.mrb[8].mxu1 %vm279_vm1, %v261_v57  ;;  %v263_v63 = vmax.f32 %v229_v60, 0.0 }
  0xf3   :  { %v262_v0 = vmax.f32 %v224_v62, 0.0  ;;  %v1019_v1 = vpop.f32.mrb[12].mxu0 }
  0xf4   :  { %v239_v2 = vadd.f32 %v1019_v1, %v852_v28  ;;  %v233_v3 = vpop.f32.mrb[13].mxu0 }
  0xf5   :  { %1046 = vmatprep.mubr.msk.f32.mxu1 %vm279_vm1, %v262_v0  ;;  %v234_v4 = vadd.f32 %v852_v28, %v233_v3 }
  0xf6   :  { %1047 = vmatmul.mubr.msk.f32.gmra.mrb[10].mxu1 %vm279_vm1, %v263_v63  ;;  %v265_v5 = vmax.f32 %v239_v2, 0.0 }
  0xf7   :  { %v264_v6 = vmax.f32 %v234_v4, 0.0  ;;  %v1022_v7 = vpop.f32.mrb[14].mxu0 }
  0xf8   :  { %v249_v8 = vadd.f32 %v1022_v7, %v852_v28  ;;  %v243_v9 = vpop.f32.mrb[15].mxu0 }
  0xf9   :  { %1049 = vmatprep.mubr.msk.f32.mxu1 %vm279_vm1, %v264_v6  ;;  %v244_v10 = vadd.f32 %v852_v28, %v243_v9 }
  0xfa   :  { %1050 = vmatmul.mubr.msk.f32.gmra.mrb[12].mxu1 %vm279_vm1, %v265_v5  ;;  %v267_v11 = vmax.f32 %v249_v8, 0.0 }
  0xfb   :  { %v266_v12 = vmax.f32 %v244_v10, 0.0 }
  0xfd   :  { %1052 = vmatprep.mubr.msk.f32.mxu1 %vm279_vm1, %v266_v12 }
  0xfe   :  { %1053 = vmatmul.mubr.msk.f32.gmra.mrb[14].mxu1 %vm279_vm1, %v267_v11 }
  0xff   :  { %1115 = vmatprep.mubr.msk.f32.mxu1 %vm58_vm0, %v691_v46 }
 0x1b5   :  { %v1033_v14 = vpop.f32.mrb[0].mxu1 }
 0x1b6   :  { %v394_v15 = vpop.f32.mrb[1].mxu1  ;;  %v400_v17 = vadd.f32 %v1033_v14, %v869_v13 }
 0x1b7   :  { %v395_v16 = vadd.f32 %v869_v13, %v394_v15 }
 0x1b9   :  { %v1036_v18 = vpop.f32.mrb[2].mxu1  ;;  %1059 = vmatprep.mubr.msk.f32.mxu0 %vm58_vm0, %v395_v16 }
 0x1ba   :  { %v410_v19 = vadd.f32 %v1036_v18, %v869_v13  ;;  %v404_v20 = vpop.f32.mrb[3].mxu1  ;;  %1060 = vmatmul.mubr.msk.f32.vlgmr.msra.gmra.mrb[16].mxu0 %vm58_vm0, %v400_v17 }
 0x1bb   :  { %v405_v21 = vadd.f32 %v869_v13, %v404_v20 }
 0x1bd   :  { %1062 = vmatprep.mubr.msk.f32.mxu0 %vm58_vm0, %v405_v21  ;;  %v1039_v22 = vpop.f32.mrb[4].mxu1 }
 0x1be   :  { %1063 = vmatmul.mubr.msk.f32.gmra.mrb[18].mxu0 %vm58_vm0, %v410_v19  ;;  %v420_v23 = vadd.f32 %v1039_v22, %v869_v13  ;;  %v414_v24 = vpop.f32.mrb[5].mxu1 }
 0x1bf   :  { %v415_v25 = vadd.f32 %v869_v13, %v414_v24 }
 0x1c1   :  { %1065 = vmatprep.mubr.msk.f32.mxu0 %vm58_vm0, %v415_v25  ;;  %v1042_v26 = vpop.f32.mrb[6].mxu1 }
 0x1c2   :  { %1066 = vmatmul.mubr.msk.f32.gmra.mrb[20].mxu0 %vm58_vm0, %v420_v23  ;;  %v430_v27 = vadd.f32 %v1042_v26, %v869_v13  ;;  %v424_v28 = vpop.f32.mrb[7].mxu1 }
 0x1c3   :  { %v425_v29 = vadd.f32 %v869_v13, %v424_v28 }
 0x1c5   :  { %1068 = vmatprep.mubr.msk.f32.mxu0 %vm58_vm0, %v425_v29  ;;  %v1045_v30 = vpop.f32.mrb[8].mxu1 }
 0x1c6   :  { %1069 = vmatmul.mubr.msk.f32.gmra.mrb[22].mxu0 %vm58_vm0, %v430_v27  ;;  %v440_v31 = vadd.f32 %v1045_v30, %v869_v13  ;;  %v434_v32 = vpop.f32.mrb[9].mxu1 }
 0x1c7   :  { %v435_v33 = vadd.f32 %v869_v13, %v434_v32 }
 0x1c9   :  { %1071 = vmatprep.mubr.msk.f32.mxu0 %vm58_vm0, %v435_v33  ;;  %v1048_v34 = vpop.f32.mrb[10].mxu1 }
 0x1ca   :  { %1072 = vmatmul.mubr.msk.f32.gmra.mrb[24].mxu0 %vm58_vm0, %v440_v31  ;;  %v450_v35 = vadd.f32 %v1048_v34, %v869_v13  ;;  %v444_v36 = vpop.f32.mrb[11].mxu1 }
 0x1cb   :  { %v445_v37 = vadd.f32 %v869_v13, %v444_v36 }
 0x1cd   :  { %1074 = vmatprep.mubr.msk.f32.mxu0 %vm58_vm0, %v445_v37  ;;  %v1051_v38 = vpop.f32.mrb[12].mxu1 }
 0x1ce   :  { %1075 = vmatmul.mubr.msk.f32.gmra.mrb[26].mxu0 %vm58_vm0, %v450_v35  ;;  %v460_v39 = vadd.f32 %v1051_v38, %v869_v13  ;;  %v454_v40 = vpop.f32.mrb[13].mxu1 }
 0x1cf   :  { %v455_v41 = vadd.f32 %v869_v13, %v454_v40 }
 0x1d1   :  { %1077 = vmatprep.mubr.msk.f32.mxu0 %vm58_vm0, %v455_v41  ;;  %v1054_v42 = vpop.f32.mrb[14].mxu1 }
 0x1d2   :  { %1078 = vmatmul.mubr.msk.f32.gmra.mrb[28].mxu0 %vm58_vm0, %v460_v39  ;;  %v470_v43 = vadd.f32 %v1054_v42, %v869_v13  ;;  %v464_v44 = vpop.f32.mrb[15].mxu1 }
 0x1d3   :  { %v465_v45 = vadd.f32 %v869_v13, %v464_v44  ;;  %v692_v44 = vld [vmem:[%s1465_s7 + $0x8] sm:$0xff] }
 0x1d5   :  { %1080 = vmatprep.mubr.msk.f32.mxu0 %vm58_vm0, %v465_v45  ;;  %v698_v45 = vpop.permute.xlu0 %697 }
 0x1d6   :  { %1081 = vmatmul.mubr.msk.f32.gmra.mrb[30].mxu0 %vm58_vm0, %v470_v43 }
 0x1d9   :  { %v703_v46 = vpop.permute.xlu0 %702 }
 0x28d   :  { %v1061_v51 = vpop.f32.mrb[16].mxu0 }
 0x28e   :  { %v602_v52 = vadd.f32 %v1061_v51, %v886_v50  ;;  %v596_v53 = vpop.f32.mrb[17].mxu0 }
 0x28f   :  { %v597_v54 = vadd.f32 %v886_v50, %v596_v53 }
 0x290   :  { %v676_v55 = vmax.f32 %v602_v52, 0.0 }
 0x291   :  { %v675_v56 = vmax.f32 %v597_v54, 0.0  ;;  %v1064_v57 = vpop.f32.mrb[18].mxu0 }
 0x292   :  { %v612_v58 = vadd.f32 %v1064_v57, %v886_v50  ;;  %v606_v59 = vpop.f32.mrb[19].mxu0 }
 0x293   :  { %v1134_v61 = vpack.c.bf16 %v676_v55, %v675_v56  ;;  %v607_v62 = vadd.f32 %v886_v50, %v606_v59 }
 0x294   :  { %v678_v63 = vmax.f32 %v612_v58, 0.0 }
 0x295   :  { %v677_v0 = vmax.f32 %v607_v62, 0.0  ;;  %1136 = vmatprep.subr.msk.bf16.mxu1 %vm1406_vm2, %v1134_v61  ;;  %v1067_v1 = vpop.f32.mrb[20].mxu0 }
 0x296   :  { %1139 = vmatpush3.bf16.xpose.msk.msra.mxu1 %vm1406_vm2, %v1134_v61  ;;  %v622_v2 = vadd.f32 %v1067_v1, %v886_v50  ;;  %v616_v3 = vpop.f32.mrb[21].mxu0 }
 0x297   :  { %v1140_v4 = vpack.c.bf16 %v678_v63, %v677_v0  ;;  %v617_v5 = vadd.f32 %v886_v50, %v616_v3 }
 0x298   :  { %v680_v6 = vmax.f32 %v622_v2, 0.0 }
 0x299   :  { %v679_v7 = vmax.f32 %v617_v5, 0.0  ;;  %1142 = vmatprep.subr.msk.bf16.mxu1 %vm1406_vm2, %v1140_v4  ;;  %v1070_v8 = vpop.f32.mrb[22].mxu0 }
 0x29a   :  { %v632_v9 = vadd.f32 %v1070_v8, %v886_v50  ;;  %v626_v10 = vpop.f32.mrb[23].mxu0 }
 0x29b   :  { %v1146_v11 = vpack.c.bf16 %v680_v6, %v679_v7  ;;  %v627_v12 = vadd.f32 %v886_v50, %v626_v10 }
 0x29c   :  { %v682_v13 = vmax.f32 %v632_v9, 0.0 }
 0x29d   :  { %v681_v14 = vmax.f32 %v627_v12, 0.0  ;;  %v1073_v15 = vpop.f32.mrb[24].mxu0 }
 0x29e   :  { %1145 = vmatpush3.bf16.xpose.msk.msra.mxu1 %vm1406_vm2, %v1140_v4  ;;  %v642_v16 = vadd.f32 %v1073_v15, %v886_v50  ;;  %v636_v17 = vpop.f32.mrb[25].mxu0 }
 0x29f   :  { %1148 = vmatprep.subr.msk.bf16.mxu1 %vm1406_vm2, %v1146_v11  ;;  %v1152_v18 = vpack.c.bf16 %v682_v13, %v681_v14  ;;  %v637_v19 = vadd.f32 %v886_v50, %v636_v17 }
 0x2a0   :  { %v684_v20 = vmax.f32 %v642_v16, 0.0 }
 0x2a1   :  { %v683_v21 = vmax.f32 %v637_v19, 0.0  ;;  %v1076_v22 = vpop.f32.mrb[26].mxu0 }
 0x2a2   :  { %v652_v23 = vadd.f32 %v1076_v22, %v886_v50  ;;  %v646_v24 = vpop.f32.mrb[27].mxu0 }
 0x2a3   :  { %v1158_v25 = vpack.c.bf16 %v684_v20, %v683_v21  ;;  %v647_v26 = vadd.f32 %v886_v50, %v646_v24 }
 0x2a4   :  { %v686_v27 = vmax.f32 %v652_v23, 0.0 }
 0x2a5   :  { %v685_v28 = vmax.f32 %v647_v26, 0.0  ;;  %v1079_v29 = vpop.f32.mrb[28].mxu0 }
 0x2a6   :  { %1151 = vmatpush3.bf16.xpose.msk.msra.mxu1 %vm1406_vm2, %v1146_v11  ;;  %v662_v30 = vadd.f32 %v1079_v29, %v886_v50  ;;  %v656_v31 = vpop.f32.mrb[29].mxu0 }
 0x2a7   :  { %1154 = vmatprep.subr.msk.bf16.mxu1 %vm1406_vm2, %v1152_v18  ;;  %v1164_v32 = vpack.c.bf16 %v686_v27, %v685_v28  ;;  %v657_v33 = vadd.f32 %v886_v50, %v656_v31 }
 0x2a8   :  { %v688_v34 = vmax.f32 %v662_v30, 0.0 }
 0x2a9   :  { %v687_v35 = vmax.f32 %v657_v33, 0.0  ;;  %v1082_v36 = vpop.f32.mrb[30].mxu0 }
 0x2aa   :  { %v672_v37 = vadd.f32 %v1082_v36, %v886_v50  ;;  %v666_v38 = vpop.f32.mrb[31].mxu0 }
 0x2ab   :  { %v1170_v39 = vpack.c.bf16 %v688_v34, %v687_v35  ;;  %v667_v40 = vadd.f32 %v886_v50, %v666_v38 }
 0x2ac   :  { %v690_v41 = vmax.f32 %v672_v37, 0.0 }
 0x2ad   :  { %v689_v42 = vmax.f32 %v667_v40, 0.0 }
 0x2ae   :  { %1157 = vmatpush3.bf16.xpose.msk.msra.mxu1 %vm1406_vm2, %v1152_v18 }
 0x2af   :  { %1160 = vmatprep.subr.msk.bf16.mxu1 %vm1406_vm2, %v1158_v25  ;;  %v1176_v43 = vpack.c.bf16 %v690_v41, %v689_v42 }
 0x2b6   :  { %1163 = vmatpush3.bf16.xpose.msk.msra.mxu1 %vm1406_vm2, %v1158_v25 }
 0x2b7   :  { %1166 = vmatprep.subr.msk.bf16.mxu1 %vm1406_vm2, %v1164_v32 }
 0x2be   :  { %1169 = vmatpush3.bf16.xpose.msk.msra.mxu1 %vm1406_vm2, %v1164_v32 }
 0x2bf   :  { %1172 = vmatprep.subr.msk.bf16.mxu1 %vm1406_vm2, %v1170_v39 }
 0x2c6   :  { %1175 = vmatpush3.bf16.xpose.msk.msra.mxu1 %vm1406_vm2, %v1170_v39 }
 0x2c7   :  { %1178 = vmatprep.subr.msk.bf16.mxu1 %vm1406_vm2, %v1176_v43 }
 0x2ce   :  { %1181 = vmatpush3.bf16.xpose.msk.msra.mxu1 %vm1406_vm2, %v1176_v43 }
 0x2d5   :  { %1116 = vmatmul.mubr.msk.f32.vlgmr.msra.gmra.mrb[16].mxu1 %vm58_vm0, %v692_v44 }
 0x3a8   :  { %v1117_v47 = vpop.f32.mrb[16].mxu1 }
 0x3a9   :  { %v831_v48 = vadd.f32 %v1117_v47, %v703_v46  ;;  %v825_v49 = vpop.f32.mrb[17].mxu1 }
 0x3aa   :  { %v826_v50 = vadd.f32 %v825_v49, %v698_v45 }
 0x3ab   :  { %835 = vst [vmem:[#allocation2 + $0x8] sm:$0xff] %v831_v48 }
 0x3ac   :  { %834 = vst [vmem:[#allocation2] sm:$0xff] %v826_v50 }
 0x3ad   :  { %1198 = shalt.err (!%p1195_p4)
}
 0x3ae   :  { %s1199_s23 = scalar_lea.hbm %s1467_s9, 256 }
 0x3af   :  { %p1200_p5 = scmp.ne.s32.totalorder %s1467_s9, %s1199_s23  ;;  %p1203_p6 = scmp.lt.u32.totalorder %s1199_s23, %s1467_s9 }
 0x3b1   :  { %p1205_p7 = pnand %p1203_p6, %p1200_p5 }
 0x3b3   :  { %1208 = shalt.err (!%p1205_p7)
}
 0x3b4   :  { %s1213_s28 = smov 128   ;;  %s1214_s29 = smov 8  }
 0x3b5   :  { %847 = dma.vmem_to_hbm [thread:$0]  %s842_s20, 256, %s1467_s9, [#allocation3], %s1213_s28, %s1213_s28, %s1214_s29  }
 0x3b6   :  { %1209 = dma.done.wait [#allocation3], 256  }
 0x3b7   :  { %1210 = vsyncadd [#allocation3], 4294967040 }
 0x3b8   :  { %851 = vsyncpa [#allocation3], 1 }

</bundles_post_ra>
